<compile_context>
chip_gen: v5e
topology: v5e:2x2
jax: 0.10.0
libtpu: 0.0.40
codegen_flags: <defaults>
</compile_context>

<pallas_src>
import functools

import jax
import jax.numpy as jnp
from jax.experimental import pallas as pl
from jax.experimental.pallas import tpu as pltpu


def _round_up(x, m):
    return (x + m - 1) // m * m


def highway_kernel(x_ref, wp_ref, wg_ref, bp_ref, bg_ref, o_ref, *, n_col_tiles):
    x = x_ref[...]                                       # (tm, E)

    # Feed the MXU matching dtypes: mixed f32 x bf16 silently promotes to a
    # slower f32 matmul, so cast the activation tile to the weight dtype.
    # Accumulation stays f32 via preferred_element_type.
    mm_dtype = wp_ref.dtype
    x_mm = x if x.dtype == mm_dtype else x.astype(mm_dtype)

    yp = jnp.dot(x_mm, wp_ref[...], preferred_element_type=jnp.float32) + bp_ref[...]
    yg = jnp.dot(x_mm, wg_ref[...], preferred_element_type=jnp.float32) + bg_ref[...]

    proj = jnp.maximum(yp, 0.0)                          # relu(x @ Wp + bp)
    # sigmoid(g) == 0.5 * (tanh(g/2) + 1): one EUP op and exact f32 numerics
    # (replaces pl.reciprocal(approx=True), which rounds through bf16).
    gate = 0.5 * (jnp.tanh(0.5 * yg) + 1.0)

    # Residual slice of x matching this output-column tile.
    if n_col_tiles == 1:
        x_res = x
    else:
        tn = o_ref.shape[-1]
        off = pl.multiple_of(pl.program_id(1) * tn, tn)  # lane-aligned (tn % 128 == 0)
        x_res = x[:, pl.ds(off, tn)]

    xf = x_res.astype(jnp.float32)
    # highway = proj*gate + x*(1-gate) == x + gate*(proj - x)
    o_ref[...] = (xf + gate * (proj - xf)).astype(o_ref.dtype)


def _vmem_budget_bytes():
    """Scoped-VMEM budget: ~3/4 of per-core VMEM, capped at 100 MiB.

    v5e/v6e (128 MiB parts) -> ~96 MiB usable; v7x (64 MiB) -> ~48 MiB.
    Headroom is left for compiler internal scratch / semaphores.
    """
    try:
        cap = int(pltpu.get_tpu_info().vmem_capacity_bytes)
    except Exception:  # no TPU visible (e.g. interpret mode) -> be conservative
        cap = 64 << 20
    return min(cap * 3 // 4, 100 << 20)


def _pick_col_tile(e, w_itemsize, budget):
    """Output-feature tile for Wp/Wg. Full (resident) when they fit comfortably."""
    resident = 2 * 2 * e * e * w_itemsize                # Wp+Wg, 2 pipeline buffers
    if resident <= budget // 2 or e % 128 != 0:
        return e
    tn = (budget // 2) // (2 * 2 * e * w_itemsize)
    tn = max(128, min(e, (tn // 128) * 128))
    while e % tn:                                        # make it divide e (e % 128 == 0 here)
        tn -= 128
    return tn


def _pick_row_tile(n, e, tn, x_itemsize, w_itemsize, budget):
    """Byte-targeted row tile. Returns (tm, padded_row_count)."""
    # Per-row VMEM: double-buffered x row (full width) + out tile, plus f32
    # intermediates (yp, yg, proj/gate, x residual cast).
    row_bytes = 2 * e * x_itemsize + 2 * tn * x_itemsize + 4 * tn * 4 + e * 4
    w_bytes = 2 * 2 * e * tn * w_itemsize
    avail = budget - w_bytes - (2 << 20)
    tm_cap = max(8, avail // max(row_bytes, 1))
    # Aim for a ~4 MiB activation tile: small row-count tiles (e.g. 512x32 =
    # 64 KiB) leave the kernel dominated by the ~0.35 us per-grid-step cost.
    tm_target = max(8, (4 << 20) // (e * x_itemsize))
    tm = int(min(tm_cap, tm_target, 1 << 15))

    if tm >= n:
        # Single full-extent block (block dim == array dim): always legal, no pad.
        return n, n

    tm = max(8, (tm // 8) * 8)
    # Prefer a tile that divides n exactly (avoids a wrapper-side jnp.pad HBM
    # pass) and, secondarily, an even step count (v7x shares the grid over 2 TCs).
    lo = max(8, tm // 2)
    for want_even in (True, False):
        t = tm
        while t >= lo:
            if n % t == 0 and (not want_even or (n // t) % 2 == 0):
                return t, n
            t -= 8
    return tm, _round_up(n, tm)


def highway(x, wp, bp, wg, bg, *, param_dtype=None):
    """Highway forward: relu(x@Wp+bp)*g + x*(1-g), g = sigmoid(x@Wg+bg).

    x: [..., E]; wp/wg: [E, E] laid out (in_features, out_features), i.e.
    transposed vs torch nn.Linear.weight; bp/bg: [E].
    param_dtype: optionally cast weights (e.g. jnp.bfloat16) to halve weight
    HBM/VMEM traffic; prefer storing weights in bf16 up front so the cast is
    not paid on every call.
    """
    orig_shape = x.shape
    e = orig_shape[-1]
    x2 = x.reshape(-1, e)
    n = x2.shape[0]

    if param_dtype is not None:
        wp = wp.astype(param_dtype)
        wg = wg.astype(param_dtype)
    bp2 = bp.astype(jnp.float32).reshape(1, e)
    bg2 = bg.astype(jnp.float32).reshape(1, e)

    budget = _vmem_budget_bytes()
    tn = _pick_col_tile(e, wp.dtype.itemsize, budget)
    tm, n_pad = _pick_row_tile(n, e, tn, x2.dtype.itemsize, wp.dtype.itemsize, budget)
    n_col = e // tn if e % tn == 0 else 1

    x_in = x2 if n_pad == n else jnp.pad(x2, ((0, n_pad - n), (0, 0)))
    grid = (n_pad // tm, n_col)

    # Explicit scoped-VMEM request (default cap is 32 MiB): double-buffered
    # x/out tiles + weight tiles + biases + f32 intermediates.
    needed = (2 * tm * e * x2.dtype.itemsize
              + 2 * tm * tn * x2.dtype.itemsize
              + 2 * 2 * e * tn * wp.dtype.itemsize
              + 2 * 2 * 8 * tn * 4
              + tm * e * 4
              + 4 * tm * tn * 4)
    if needed + (2 << 20) > budget:
        # Only reachable for large, non-128-aligned E where the weight cannot
        # be tiled lane-aligned: request what is needed and fail loudly rather
        # than silently under-provision the pipeline buffers.
        vmem_limit = int(needed + (2 << 20))
    else:
        vmem_limit = int(min(budget, max(32 << 20, needed + (2 << 20))))

    # NOTE: the weight/bias index maps are constant, so there is exactly one
    # DMA per array regardless of buffer count; pl.Buffered(1) would reclaim
    # one VMEM copy but is left at the portable default here.
    # TODO(synk): for E < 128 (e.g. E=32) the output stores are masked partial
    # vst (32/128 lanes); a wrapper-side repack to a lane-dense slab would cut
    # the remaining (wall - compute) gap.
    kernel = functools.partial(highway_kernel, n_col_tiles=n_col)
    out = pl.pallas_call(
        kernel,
        out_shape=jax.ShapeDtypeStruct((n_pad, e), x2.dtype),
        grid_spec=pltpu.PrefetchScalarGridSpec(
            num_scalar_prefetch=0,
            grid=grid,
            in_specs=[
                pl.BlockSpec((tm, e), lambda i, j: (i, 0)),    # x rows, full width
                pl.BlockSpec((e, tn), lambda i, j: (0, j)),    # Wp column tile
                pl.BlockSpec((e, tn), lambda i, j: (0, j)),    # Wg column tile
                pl.BlockSpec((1, tn), lambda i, j: (0, j)),    # bp
                pl.BlockSpec((1, tn), lambda i, j: (0, j)),    # bg
            ],
            out_specs=pl.BlockSpec((tm, tn), lambda i, j: (i, j)),
        ),
        compiler_params=pltpu.CompilerParams(
            dimension_semantics=("parallel", "arbitrary"),
            vmem_limit_bytes=vmem_limit,
        ),
    )(x_in, wp, wg, bp2, bg2)

    out = out if n_pad == n else out[:n]
    return out.reshape(orig_shape)


def highway_ref(x, wp, bp, wg, bg):
    proj = jnp.maximum(x @ wp + bp, 0.0)
    gate = jax.nn.sigmoid(x @ wg + bg)
    return proj * gate + x * (1.0 - gate)


if __name__ == "__main__":
    embed_size = 32
    N = 64  # e.g. batch * seq flattened; the Linear layers act on the last dim

    key = jax.random.PRNGKey(0)
    kx, kwp, kbp, kwg, kbg = jax.random.split(key, 5)

    x  = jax.random.normal(kx,  (N, embed_size), dtype=jnp.float32)
    wp = jax.random.normal(kwp, (embed_size, embed_size), dtype=jnp.float32) * 0.1
    bp = jax.random.normal(kbp, (embed_size,),            dtype=jnp.float32) * 0.1
    wg = jax.random.normal(kwg, (embed_size, embed_size), dtype=jnp.float32) * 0.1
    bg = jax.random.normal(kbg, (embed_size,),            dtype=jnp.float32) * 0.1

    out = jax.block_until_ready(highway(x, wp, bp, wg, bg))
    ref = highway_ref(x, wp, bp, wg, bg)
    assert out.shape == (N, embed_size)
    assert jnp.allclose(out, ref, atol=1e-4, rtol=1e-4), "mismatch vs reference"

    # Ragged row count (not a multiple of 8): handled as one full-extent block.
    x2 = x[:50]
    out2 = jax.block_until_ready(highway(x2, wp, bp, wg, bg))
    ref2 = highway_ref(x2, wp, bp, wg, bg)
    assert out2.shape == (50, embed_size)
    assert jnp.allclose(out2, ref2, atol=1e-4, rtol=1e-4), "mismatch vs reference (tail)"

    # Higher-rank input, like the torch module (Linear on the last dim only).
    x3 = x.reshape(2, 32, embed_size)
    out3 = jax.block_until_ready(highway(x3, wp, bp, wg, bg))
    ref3 = highway_ref(x3, wp, bp, wg, bg)
    assert out3.shape == x3.shape
    assert jnp.allclose(out3, ref3, atol=1e-4, rtol=1e-4), "mismatch vs reference (3D)"

    print("KERNEL_OK")
</pallas_src>

<mosaic_0001>
module attributes {stable_mosaic.version = 11 : i64} {
  func.func @highway_kernel(%arg0: i32, %arg1: i32, %arg2: memref<64x32xf32, #tpu.memory_space<vmem>>, %arg3: memref<32x32xf32, #tpu.memory_space<vmem>>, %arg4: memref<32x32xf32, #tpu.memory_space<vmem>>, %arg5: memref<1x32xf32, #tpu.memory_space<vmem>>, %arg6: memref<1x32xf32, #tpu.memory_space<vmem>>, %arg7: memref<64x32xf32, #tpu.memory_space<vmem>>) attributes {dimension_semantics = [#tpu.dimension_semantics<parallel>, #tpu.dimension_semantics<arbitrary>], iteration_bounds = array<i64: 1, 1>, scalar_prefetch = 0 : i64, scratch_operands = 0 : i64, tpu.core_type = #tpu.core_type<tc>, window_params = [{transform_indices = @transform_0, window_bounds = array<i64: 64, 32>}, {transform_indices = @transform_1, window_bounds = array<i64: 32, 32>}, {transform_indices = @transform_2, window_bounds = array<i64: 32, 32>}, {transform_indices = @transform_3, window_bounds = array<i64: 1, 32>}, {transform_indices = @transform_4, window_bounds = array<i64: 1, 32>}, {transform_indices = @transform_5, window_bounds = array<i64: 64, 32>}]} {
    %c0 = arith.constant 0 : index
    %c0_0 = arith.constant 0 : index
    %0 = vector.load %arg2[%c0, %c0_0] : memref<64x32xf32, #tpu.memory_space<vmem>>, vector<64x32xf32>
    %c0_1 = arith.constant 0 : index
    %c0_2 = arith.constant 0 : index
    %1 = vector.load %arg3[%c0_1, %c0_2] : memref<32x32xf32, #tpu.memory_space<vmem>>, vector<32x32xf32>
    %cst = arith.constant dense<0.000000e+00> : vector<64x32xf32>
    %2 = tpu.matmul %0, %1, %cst {dimension_numbers = #tpu.dot_dimension_numbers<[1], [0], [0], [1], [0, 0, 1, 1], [], []>} : vector<64x32xf32>, vector<32x32xf32>, vector<64x32xf32> -> vector<64x32xf32>
    %c0_3 = arith.constant 0 : index
    %c0_4 = arith.constant 0 : index
    %3 = vector.load %arg5[%c0_3, %c0_4] : memref<1x32xf32, #tpu.memory_space<vmem>>, vector<1x32xf32>
    %4 = vector.broadcast %3 : vector<1x32xf32> to vector<64x32xf32>
    %5 = arith.addf %2, %4 : vector<64x32xf32>
    %c0_5 = arith.constant 0 : index
    %c0_6 = arith.constant 0 : index
    %6 = vector.load %arg4[%c0_5, %c0_6] : memref<32x32xf32, #tpu.memory_space<vmem>>, vector<32x32xf32>
    %cst_7 = arith.constant dense<0.000000e+00> : vector<64x32xf32>
    %7 = tpu.matmul %0, %6, %cst_7 {dimension_numbers = #tpu.dot_dimension_numbers<[1], [0], [0], [1], [0, 0, 1, 1], [], []>} : vector<64x32xf32>, vector<32x32xf32>, vector<64x32xf32> -> vector<64x32xf32>
    %c0_8 = arith.constant 0 : index
    %c0_9 = arith.constant 0 : index
    %8 = vector.load %arg6[%c0_8, %c0_9] : memref<1x32xf32, #tpu.memory_space<vmem>>, vector<1x32xf32>
    %9 = vector.broadcast %8 : vector<1x32xf32> to vector<64x32xf32>
    %10 = arith.addf %7, %9 : vector<64x32xf32>
    %cst_10 = arith.constant 0.000000e+00 : f32
    %11 = vector.broadcast %cst_10 : f32 to vector<64x32xf32>
    %12 = arith.maximumf %5, %11 : vector<64x32xf32>
    %cst_11 = arith.constant 5.000000e-01 : f32
    %13 = vector.broadcast %cst_11 : f32 to vector<64x32xf32>
    %14 = arith.mulf %13, %10 : vector<64x32xf32>
    %15 = math.tanh %14 : vector<64x32xf32>
    %cst_12 = arith.constant 1.000000e+00 : f32
    %16 = vector.broadcast %cst_12 : f32 to vector<64x32xf32>
    %17 = arith.addf %15, %16 : vector<64x32xf32>
    %cst_13 = arith.constant 5.000000e-01 : f32
    %18 = vector.broadcast %cst_13 : f32 to vector<64x32xf32>
    %19 = arith.mulf %18, %17 : vector<64x32xf32>
    %20 = arith.subf %12, %0 : vector<64x32xf32>
    %21 = arith.mulf %19, %20 : vector<64x32xf32>
    %22 = arith.addf %0, %21 : vector<64x32xf32>
    %c0_14 = arith.constant 0 : index
    %c0_15 = arith.constant 0 : index
    %23 = vector.load %arg7[%c0_14, %c0_15] : memref<64x32xf32, #tpu.memory_space<vmem>>, vector<64x32xf32>
    tpu.vector_store %arg7[%c0_14, %c0_15], %22 {strides = array<i32>} : memref<64x32xf32, #tpu.memory_space<vmem>>, vector<64x32xf32>,
    return
  }
  func.func @transform_0(%arg0: i32, %arg1: i32) -> (i32, i32) {
    %c0_i32 = arith.constant 0 : i32
    %c0_i32_0 = arith.constant 0 : i32
    return %arg0, %c0_i32 : i32, i32
  }
  func.func @transform_1(%arg0: i32, %arg1: i32) -> (i32, i32) {
    %c0_i32 = arith.constant 0 : i32
    %c0_i32_0 = arith.constant 0 : i32
    return %c0_i32, %arg1 : i32, i32
  }
  func.func @transform_2(%arg0: i32, %arg1: i32) -> (i32, i32) {
    %c0_i32 = arith.constant 0 : i32
    %c0_i32_0 = arith.constant 0 : i32
    return %c0_i32, %arg1 : i32, i32
  }
  func.func @transform_3(%arg0: i32, %arg1: i32) -> (i32, i32) {
    %c0_i32 = arith.constant 0 : i32
    %c0_i32_0 = arith.constant 0 : i32
    return %c0_i32, %arg1 : i32, i32
  }
  func.func @transform_4(%arg0: i32, %arg1: i32) -> (i32, i32) {
    %c0_i32 = arith.constant 0 : i32
    %c0_i32_0 = arith.constant 0 : i32
    return %c0_i32, %arg1 : i32, i32
  }
  func.func @transform_5(%arg0: i32, %arg1: i32) -> (i32, i32) {
    %c0_i32 = arith.constant 0 : i32
    return %arg0, %arg1 : i32, i32
  }
}

</mosaic_0001>

<bundles_post_ra>
// kernel: tpu_custom_call.1
= control target key start
LH: loop header
LB: loop body
LE: loop exit
PB: predicated region body
PF: predicated region fallthrough
CT: control target
= control target key end

     0   :  { %vm36_vm0 = vcmask 261120   ;;  %s469_s2 = inlined_call_operand.vmem [shape: f32[32,32], index: 2, kind: input, shape index: {}]   ;;  %s470_s1 = inlined_call_operand.vmem [shape: f32[32,32], index: 1, kind: input, shape index: {}]   ;;  %s471_s0 = inlined_call_operand.vmem [shape: f32[64,32], index: 0, kind: input, shape index: {}]   ;;  %s472_s4 = inlined_call_operand.vmem [shape: f32[1,32], index: 4, kind: input, shape index: {}]   ;;  %s473_s3 = inlined_call_operand.vmem [shape: f32[1,32], index: 3, kind: input, shape index: {}]   ;;  %s474_s5 = inlined_call_operand.vmem [shape: f32[64,32], index: 5, kind: output, shape index: {}]  }
   0x1   :  { %v105_v0 = vld [vmem:[%s469_s2 + $0x18] sm:$0xff]  ;;  %v104_v1 = vld [vmem:[%s469_s2 + $0x10] sm:$0xff]  ;;  %v103_v3 = vld [vmem:[%s469_s2 + $0x8] sm:$0xff] }
   0x2   :  { %247 = vmatpush.msra.mxu3 %v105_v0  ;;  %122 = vmatpush.msra.mxu1 %v105_v0  ;;  %v31_v2 = vld [vmem:[%s470_s1 + $0x18] sm:$0xff]  ;;  %v30_v4 = vld [vmem:[%s470_s1 + $0x10] sm:$0xff]  ;;  %v29_v5 = vld [vmem:[%s470_s1 + $0x8] sm:$0xff] }
   0x3   :  { %243 = vmatpush.msra.mxu2 %v31_v2  ;;  %73 = vmatpush.msra.mxu0 %v31_v2  ;;  %v102_v6 = vld [vmem:[%s469_s2] sm:$0xff]  ;;  %v344_v10 = vld [vmem:[%s471_s0 + $0x28] sm:$0xff]  ;;  %v362_v12 = vld [vmem:[%s471_s0 + $0x30] sm:$0xff] }
   0x4   :  { %248 = vmatpush.msra.mxu3 %v104_v1  ;;  %123 = vmatpush.msra.mxu1 %v104_v1  ;;  %v323_v7 = vld [vmem:[%s471_s0 + $0x20] sm:$0xff]  ;;  %v349_v11 = vld [vmem:[%s471_s0 + $0x8] sm:$0xff]  ;;  %v367_v13 = vld [vmem:[%s471_s0 + $0x10] sm:$0xff] }
   0x5   :  { %244 = vmatpush.msra.mxu2 %v30_v4  ;;  %74 = vmatpush.msra.mxu0 %v30_v4  ;;  %v328_v8 = vld [vmem:[%s471_s0] sm:$0xff]  ;;  %v380_v14 = vld [vmem:[%s471_s0 + $0x38] sm:$0xff] }
   0x6   :  { %249 = vmatpush.msra.mxu3 %v103_v3  ;;  %124 = vmatpush.msra.mxu1 %v103_v3  ;;  %v28_v9 = vld [vmem:[%s470_s1] sm:$0xff]  ;;  %v385_v15 = vld [vmem:[%s471_s0 + $0x18] sm:$0xff] }
   0x7   :  { %245 = vmatpush.msra.mxu2 %v29_v5  ;;  %75 = vmatpush.msra.mxu0 %v29_v5  ;;  %v398_v16 = vld [vmem:[%s472_s4] ss:$0 sm:$0xff] }
   0x8   :  { %250 = vmatpush.msra.mxu3 %v102_v6  ;;  %125 = vmatpush.msra.mxu1 %v102_v6  ;;  %v403_v18 = vld [vmem:[%s473_s3] ss:$0 sm:$0xff] }
   0x9   :  { %239 = vmatmul.msk.f32.vlgmr.msra.gmra.mxu3 %vm36_vm0, %v323_v7  ;;  %235 = vmatmul.msk.f32.vlgmr.msra.gmra.mxu1 %vm36_vm0, %v328_v8 }
   0xa   :  { %246 = vmatpush.msra.mxu2 %v28_v9  ;;  %76 = vmatpush.msra.mxu0 %v28_v9 }
   0xb   :  { %231 = vmatmul.msk.f32.vlgmr.msra.gmra.mxu2 %vm36_vm0, %v323_v7  ;;  %227 = vmatmul.msk.f32.vlgmr.msra.gmra.mxu0 %vm36_vm0, %v328_v8 }
  0x11   :  { %240 = vmatmul.msk.f32.gmra.mxu3 %vm36_vm0, %v344_v10  ;;  %236 = vmatmul.msk.f32.gmra.mxu1 %vm36_vm0, %v349_v11 }
  0x13   :  { %232 = vmatmul.msk.f32.gmra.mxu2 %vm36_vm0, %v344_v10  ;;  %228 = vmatmul.msk.f32.gmra.mxu0 %vm36_vm0, %v349_v11 }
  0x19   :  { %241 = vmatmul.msk.f32.gmra.mxu3 %vm36_vm0, %v362_v12  ;;  %237 = vmatmul.msk.f32.gmra.mxu1 %vm36_vm0, %v367_v13 }
  0x1b   :  { %233 = vmatmul.msk.f32.gmra.mxu2 %vm36_vm0, %v362_v12  ;;  %229 = vmatmul.msk.f32.gmra.mxu0 %vm36_vm0, %v367_v13 }
  0x21   :  { %242 = vmatmul.msk.f32.gmra.mxu3 %vm36_vm0, %v380_v14  ;;  %238 = vmatmul.msk.f32.gmra.mxu1 %vm36_vm0, %v385_v15 }
  0x23   :  { %234 = vmatmul.msk.f32.gmra.mxu2 %vm36_vm0, %v380_v14  ;;  %230 = vmatmul.msk.f32.gmra.mxu0 %vm36_vm0, %v385_v15 }
  0x86   :  { %v127_v17 = vpop.f32.mrf.mxu1 }
  0x87   :  { %v128_v19 = vadd.f32 %v398_v16, %v127_v17 }
  0x88   :  { %v78_v20 = vpop.f32.mrf.mxu0 }
  0x89   :  { %v159_v21 = vmul.f32 0.5, %v128_v19  ;;  %v79_v22 = vadd.f32 %v403_v18, %v78_v20 }
  0x8b   :  { %253 = vtanh.f32 %v159_v21  ;;  %v151_v26 = vmax.f32 %v79_v22, 0.0 }
  0x8c   :  { %v139_v23 = vpop.f32.mrf.mxu3 }
  0x8d   :  { %v140_v24 = vadd.f32 %v398_v16, %v139_v23  ;;  %v191_v35 = vsub.f32 %v151_v26, %v328_v8 }
  0x8e   :  { %v130_v25 = vpop.f32.mrf.mxu1  ;;  %v90_v27 = vpop.f32.mrf.mxu2 }
  0x8f   :  { %v163_v28 = vmul.f32 0.5, %v140_v24  ;;  %v131_v29 = vadd.f32 %v398_v16, %v130_v25  ;;  %v91_v30 = vadd.f32 %v403_v18, %v90_v27 }
  0x90   :  { %v81_v31 = vpop.f32.mrf.mxu0 }
  0x91   :  { %v254_v32 = vpop.eup %253  ;;  %255 = vtanh.f32 %v163_v28  ;;  %v160_v33 = vmul.f32 0.5, %v131_v29  ;;  %v82_v36 = vadd.f32 %v403_v18, %v81_v31  ;;  %v155_v39 = vmax.f32 %v91_v30, 0.0 }
  0x92   :  { %v175_v34 = vadd.f32 1.0, %v254_v32 }
  0x93   :  { %257 = vtanh.f32 %v160_v33  ;;  %v152_v43 = vmax.f32 %v82_v36, 0.0  ;;  %v195_v50 = vsub.f32 %v155_v39, %v323_v7 }
  0x94   :  { %v183_v37 = vmul.f32 0.5, %v175_v34  ;;  %v142_v38 = vpop.f32.mrf.mxu3 }
  0x95   :  { %v143_v40 = vadd.f32 %v398_v16, %v142_v38  ;;  %v192_v57 = vsub.f32 %v152_v43, %v349_v11 }
  0x96   :  { %v199_v41 = vmul.f32 %v191_v35, %v183_v37  ;;  %v133_v42 = vpop.f32.mrf.mxu1  ;;  %v93_v44 = vpop.f32.mrf.mxu2 }
  0x97   :  { %v256_v45 = vpop.eup %255  ;;  %v164_v46 = vmul.f32 0.5, %v143_v40  ;;  %v134_v47 = vadd.f32 %v398_v16, %v133_v42  ;;  %v94_v51 = vadd.f32 %v403_v18, %v93_v44 }
  0x98   :  { %v179_v48 = vadd.f32 1.0, %v256_v45  ;;  %v207_v49 = vadd.f32 %v199_v41, %v328_v8  ;;  %v84_v52 = vpop.f32.mrf.mxu0 }
  0x99   :  { %v258_v53 = vpop.eup %257  ;;  %259 = vtanh.f32 %v164_v46  ;;  %v161_v54 = vmul.f32 0.5, %v134_v47  ;;  %v85_v58 = vadd.f32 %v403_v18, %v84_v52  ;;  %v156_v62 = vmax.f32 %v94_v51, 0.0 }
  0x9a   :  { %v187_v55 = vmul.f32 0.5, %v179_v48  ;;  %v176_v56 = vadd.f32 1.0, %v258_v53  ;;  %215 = vst.msk [vmem:[%s474_s5] sm:$0xff] %vm36_vm0, %v207_v49 }
  0x9b   :  { %261 = vtanh.f32 %v161_v54  ;;  %v153_v3 = vmax.f32 %v85_v58, 0.0  ;;  %v196_v19 = vsub.f32 %v156_v62, %v344_v10 }
  0x9c   :  { %v184_v59 = vmul.f32 0.5, %v176_v56  ;;  %v203_v60 = vmul.f32 %v195_v50, %v187_v55  ;;  %v145_v61 = vpop.f32.mrf.mxu3 }
  0x9d   :  { %v146_v63 = vadd.f32 %v398_v16, %v145_v61  ;;  %v193_v25 = vsub.f32 %v153_v3, %v367_v13 }
  0x9e   :  { %v211_v0 = vadd.f32 %v203_v60, %v323_v7  ;;  %v200_v1 = vmul.f32 %v192_v57, %v184_v59  ;;  %v136_v2 = vpop.f32.mrf.mxu1  ;;  %v96_v4 = vpop.f32.mrf.mxu2 }
  0x9f   :  { %v260_v5 = vpop.eup %259  ;;  %v165_v6 = vmul.f32 0.5, %v146_v63  ;;  %v137_v8 = vadd.f32 %v398_v16, %v136_v2  ;;  %v97_v7 = vadd.f32 %v403_v18, %v96_v4 }
  0xa0   :  { %v180_v9 = vadd.f32 1.0, %v260_v5  ;;  %219 = vst.msk [vmem:[%s474_s5 + $0x20] sm:$0xff] %vm36_vm0, %v211_v0  ;;  %v208_v17 = vadd.f32 %v200_v1, %v349_v11  ;;  %v87_v20 = vpop.f32.mrf.mxu0 }
  0xa1   :  { %v262_v21 = vpop.eup %261  ;;  %263 = vtanh.f32 %v165_v6  ;;  %v162_v22 = vmul.f32 0.5, %v137_v8  ;;  %v88_v26 = vadd.f32 %v403_v18, %v87_v20  ;;  %v157_v29 = vmax.f32 %v97_v7, 0.0 }
  0xa2   :  { %v188_v23 = vmul.f32 0.5, %v180_v9  ;;  %v177_v24 = vadd.f32 1.0, %v262_v21  ;;  %216 = vst.msk [vmem:[%s474_s5 + $0x8] sm:$0xff] %vm36_vm0, %v208_v17 }
  0xa3   :  { %265 = vtanh.f32 %v162_v22  ;;  %v154_v33 = vmax.f32 %v88_v26, 0.0  ;;  %v197_v39 = vsub.f32 %v157_v29, %v362_v12 }
  0xa4   :  { %v185_v11 = vmul.f32 0.5, %v177_v24  ;;  %v204_v27 = vmul.f32 %v196_v19, %v188_v23  ;;  %v148_v28 = vpop.f32.mrf.mxu3 }
  0xa5   :  { %v149_v30 = vadd.f32 %v398_v16, %v148_v28  ;;  %v194_v42 = vsub.f32 %v154_v33, %v385_v15 }
  0xa6   :  { %v212_v31 = vadd.f32 %v204_v27, %v344_v10  ;;  %v201_v32 = vmul.f32 %v193_v25, %v185_v11  ;;  %v99_v34 = vpop.f32.mrf.mxu2 }
  0xa7   :  { %v264_v35 = vpop.eup %263  ;;  %v166_v36 = vmul.f32 0.5, %v149_v30  ;;  %v100_v40 = vadd.f32 %v403_v18, %v99_v34 }
  0xa8   :  { %v181_v37 = vadd.f32 1.0, %v264_v35  ;;  %220 = vst.msk [vmem:[%s474_s5 + $0x28] sm:$0xff] %vm36_vm0, %v212_v31  ;;  %v209_v38 = vadd.f32 %v201_v32, %v367_v13 }
  0xa9   :  { %v266_v16 = vpop.eup %265  ;;  %267 = vtanh.f32 %v166_v36  ;;  %v158_v45 = vmax.f32 %v100_v40, 0.0 }
  0xaa   :  { %v189_v10 = vmul.f32 0.5, %v181_v37  ;;  %v178_v41 = vadd.f32 1.0, %v266_v16  ;;  %217 = vst.msk [vmem:[%s474_s5 + $0x10] sm:$0xff] %vm36_vm0, %v209_v38 }
  0xab   :  { %v198_v49 = vsub.f32 %v158_v45, %v380_v14 }
  0xac   :  { %v186_v43 = vmul.f32 0.5, %v178_v41  ;;  %v205_v44 = vmul.f32 %v197_v39, %v189_v10 }
  0xae   :  { %v213_v13 = vadd.f32 %v205_v44, %v362_v12  ;;  %v202_v46 = vmul.f32 %v194_v42, %v186_v43 }
  0xaf   :  { %v268_v47 = vpop.eup %267 }
  0xb0   :  { %v182_v48 = vadd.f32 1.0, %v268_v47  ;;  %221 = vst.msk [vmem:[%s474_s5 + $0x30] sm:$0xff] %vm36_vm0, %v213_v13  ;;  %v210_v18 = vadd.f32 %v202_v46, %v385_v15 }
  0xb2   :  { %v190_v50 = vmul.f32 0.5, %v182_v48  ;;  %218 = vst.msk [vmem:[%s474_s5 + $0x18] sm:$0xff] %vm36_vm0, %v210_v18 }
  0xb4   :  { %v206_v51 = vmul.f32 %v198_v49, %v190_v50 }
  0xb6   :  { %v214_v12 = vadd.f32 %v206_v51, %v380_v14 }
  0xb8   :  { %222 = vst.msk [vmem:[%s474_s5 + $0x38] sm:$0xff] %vm36_vm0, %v214_v12 }

</bundles_post_ra>
